<compile_context>
chip_gen: v5e
topology: v5e:2x2
jax: 0.10.0
libtpu: 0.0.40
codegen_flags: <defaults>
</compile_context>

<pallas_src>
import functools

import numpy as np
import jax
import jax.numpy as jnp
from jax.experimental import pallas as pl
from jax.experimental.pallas import tpu as pltpu


# ----------------------------- configuration --------------------------------
NUM_FILTERS = 8
TOKEN_WINDOW_SIZE = (2, 3)
SENT_WINDOW_SIZE = (2, 3)        # constructed but unused in forward (as in reference)
# Hierarchical reuse of the token CNN requires num_filters * len(windows) == feat_dim
FEAT_DIM = NUM_FILTERS * len(TOKEN_WINDOW_SIZE)   # 16
assert NUM_FILTERS * len(TOKEN_WINDOW_SIZE) == FEAT_DIM

_TAIL = 8   # zero rows appended per batch block so shifted views stay in bounds


def _round_up(x, m):
    return (x + m - 1) // m * m


# ------------------------------ Pallas kernel --------------------------------
def _fused_hier_kernel(x_ref, w_ref, b_ref, lim_ref, o_ref, *, s, p1, h_max):
    """Both Context_CNN levels for ONE batch element (one grid step).

    x_ref  : (1, s*p1 + _TAIL, 2D)  token inputs of this batch; per-sentence
                                    zero-padded to p1 rows; lanes [0,D) = pre
                                    branch data, [D,2D) = pos branch data.
    w_ref  : (h_max, 2D, 4F)        block-diag conv filters per window shift
                                    (output lanes [0,2F) = pre, rest = pos).
    b_ref  : (1, 4F)                matching bias.
    lim_ref: (2, 4F) int32          per-lane last valid conv position; row 0
                                    for level 1 (L - h), row 1 for level 2
                                    (S - h).
    o_ref  : (1, 1, 4F)             pooled sentence-level features.
    """
    r1 = s * p1
    ft = o_ref.shape[-1]
    bias = b_ref[...]                                          # (1, 4F), hoisted

    # ---- level 1: token conv as h_max shifted-view MXU matmuls -------------
    x = x_ref[0]                                               # (r1 + tail, 2D)
    acc1 = jnp.dot(x[0:r1], w_ref[0], preferred_element_type=jnp.float32)
    for i in range(1, h_max):
        acc1 = acc1 + jnp.dot(x[i:i + r1], w_ref[i],
                              preferred_element_type=jnp.float32)
    act1 = jnp.maximum(acc1 + bias, 0.0)                       # (r1, 4F)

    # Mask invalid positions (per-lane window height) and pool per sentence.
    # Zeroing AFTER the ReLU is safe: pooled values are >= 0, so 0 never wins.
    act1 = act1.reshape(s, p1, ft)
    pos1 = jax.lax.broadcasted_iota(jnp.int32, (s, p1, ft), 1)
    act1 = jnp.where(pos1 <= lim_ref[0:1, :], act1, 0.0)
    pooled = jnp.max(act1, axis=1)                             # (s, 4F)

    # ---- level 2: the token CNN re-applied to the sentence features --------
    # (D == 2F asserted in the wrapper, so the same block-diag weight applies)
    x2 = jnp.concatenate(
        [pooled, jnp.zeros((_TAIL, ft), jnp.float32)], axis=0)  # (s + tail, 4F)
    acc2 = jnp.dot(x2[0:s], w_ref[0], preferred_element_type=jnp.float32)
    for i in range(1, h_max):
        acc2 = acc2 + jnp.dot(x2[i:i + s], w_ref[i],
                              preferred_element_type=jnp.float32)
    act2 = jnp.maximum(acc2 + bias, 0.0)                       # (s, 4F)
    pos2 = jax.lax.broadcasted_iota(jnp.int32, (s, ft), 0)
    act2 = jnp.where(pos2 <= lim_ref[1:2, :], act2, 0.0)
    o_ref[...] = jnp.max(act2, axis=0, keepdims=True).reshape(1, 1, ft)


# --------------------------- host-side helpers --------------------------------
def _stack_block_diag_filters(level_params, window_size):
    """Per-window (h, D, F) filters -> block-diag (h_max, 2D, 4F) + bias (1, 4F)."""
    h_max = max(window_size)

    def branch_stack(branch):
        ws, bs = [], []
        for (w, b), h in zip(level_params[branch], window_size):
            w_pad = jnp.zeros((h_max,) + w.shape[1:], jnp.float32).at[:h].set(w)
            ws.append(w_pad)
            bs.append(b)
        return jnp.concatenate(ws, axis=-1), jnp.concatenate(bs, axis=-1)

    w_pre, b_pre = branch_stack("pre")               # (h_max, D, 2F), (2F,)
    w_pos, b_pos = branch_stack("pos")
    hm, d, fb = w_pre.shape
    w = jnp.zeros((hm, 2 * d, 2 * fb), jnp.float32)
    w = w.at[:, :d, :fb].set(w_pre).at[:, d:, fb:].set(w_pos)
    bias = jnp.concatenate([b_pre, b_pos])[None, :]  # (1, 4F)
    return w, bias


def _lane_limits(window_size, num_filters, tok_len, sents_per_batch):
    """Per-lane 'last valid conv position' for level 1 and level 2 (int32)."""
    heights = np.array([h for _ in range(2) for h in window_size
                        for _ in range(num_filters)], np.int32)       # (4F,)
    return jnp.asarray(
        np.stack([tok_len - heights, sents_per_batch - heights]),
        dtype=jnp.int32)                                              # (2, 4F)


def _build_input(x_pre, x_pos, batch_size, p1):
    """(N,L,D) x2 -> (B, S*p1 + _TAIL, 2D): lanes=[pre|pos], per-sentence pad."""
    n, l, d = x_pre.shape
    x = jnp.concatenate([x_pre, x_pos], axis=-1)                      # (N, L, 2D)
    x = jnp.pad(x, ((0, 0), (0, p1 - l), (0, 0)))                     # (N, p1, 2D)
    x = x.reshape(batch_size, (n // batch_size) * p1, 2 * d)
    return jnp.pad(x, ((0, 0), (0, _TAIL), (0, 0)))


# --------------------------- module-level forward ----------------------------
def context_hierarchical_cnn_forward(x_pre, x_pos, batch_size, params,
                                     window_size=TOKEN_WINDOW_SIZE):
    """Context_Hierarchical_CNN.forward.  x_*: (N, L, D) with N = batch * sents."""
    n, l1, d = x_pre.shape
    assert x_pos.shape == x_pre.shape
    h_max = max(window_size)
    assert h_max - 1 <= _TAIL
    s = n // batch_size
    assert n == batch_size * s
    assert l1 >= h_max and s >= h_max, "sequence shorter than largest conv window"

    num_filters = params["tokens"]["pre"][0][1].shape[0]
    f_branch = num_filters * len(window_size)          # per-branch feature width
    assert f_branch == d, "hierarchical reuse needs num_filters*len(windows) == feat_dim"

    w, bias = _stack_block_diag_filters(params["tokens"], window_size)
    d2, ft = w.shape[1], w.shape[2]                    # 2D input lanes, 4F output lanes
    p1 = _round_up(l1, 8)
    r1 = s * p1

    x_in = _build_input(x_pre, x_pos, batch_size, p1)  # (B, r1 + _TAIL, 2D)
    limits = _lane_limits(window_size, num_filters, l1, s)

    kernel = functools.partial(_fused_hier_kernel, s=s, p1=p1, h_max=h_max)

    flops = 2 * h_max * batch_size * (r1 * d2 * ft + s * ft * ft)
    bytes_accessed = 4 * (x_in.size + w.size + bias.size + limits.size
                          + batch_size * ft)

    out = pl.pallas_call(
        kernel,
        grid=(batch_size,),
        out_shape=jax.ShapeDtypeStruct((batch_size, 1, ft), jnp.float32),
        in_specs=[
            pl.BlockSpec((1, r1 + _TAIL, d2), lambda b: (b, 0, 0)),
            pl.BlockSpec(w.shape, lambda b: (0, 0, 0)),
            pl.BlockSpec(bias.shape, lambda b: (0, 0)),
            pl.BlockSpec(limits.shape, lambda b: (0, 0)),
        ],
        out_specs=pl.BlockSpec((1, 1, ft), lambda b: (b, 0, 0)),
        compiler_params=pltpu.CompilerParams(dimension_semantics=("parallel",)),
        cost_estimate=pl.CostEstimate(flops=flops, transcendentals=0,
                                      bytes_accessed=bytes_accessed),
    )(x_in, w, bias, limits)

    # lanes [0, f_branch) carry the pre branch, the remaining lanes the pos branch
    return out[:, :, :f_branch], out[:, :, f_branch:]


# ------------------------------ param init -----------------------------------
def _init_conv(key, h, feat_dim, num_filters):
    """Deterministic Conv2d(1, F, (h, feat_dim)) init (uniform +-1/sqrt(fan_in))."""
    kw, kb = jax.random.split(key)
    fan_in = 1 * h * feat_dim
    bound = 1.0 / jnp.sqrt(jnp.float32(fan_in))
    # stored as (h, D, F): w[i, d, f] == torch_weight[f, 0, i, d]
    w = jax.random.uniform(kw, (h, feat_dim, num_filters), jnp.float32, -bound, bound)
    b = jax.random.uniform(kb, (num_filters,), jnp.float32, -bound, bound)
    return w, b


def init_context_cnn_params(key, window_size, feat_dim, num_filters):
    keys = jax.random.split(key, 2 * len(window_size))
    pre = [_init_conv(keys[i], h, feat_dim, num_filters)
           for i, h in enumerate(window_size)]
    pos = [_init_conv(keys[len(window_size) + i], h, feat_dim, num_filters)
           for i, h in enumerate(window_size)]
    return {"pre": pre, "pos": pos}


def init_hierarchical_params(key):
    k_tok, k_sent = jax.random.split(key)
    return {
        "tokens": init_context_cnn_params(k_tok, TOKEN_WINDOW_SIZE, FEAT_DIM, NUM_FILTERS),
        # context_sents_cnn exists in __init__ but is unused in forward
        "sents": init_context_cnn_params(k_sent, SENT_WINDOW_SIZE, FEAT_DIM, NUM_FILTERS),
    }


# --------------------------- pure-JAX reference -------------------------------
def _ref_conv_pool(x, w, b):
    h = w.shape[0]
    l_out = x.shape[1] - h + 1
    acc = b[None, None, :]
    for i in range(h):
        acc = acc + jnp.einsum("nld,df->nlf", x[:, i:i + l_out, :], w[i],
                               precision=jax.lax.Precision.HIGHEST)
    return jnp.max(jax.nn.relu(acc), axis=1)


def _ref_context_cnn(x_pre, x_pos, batch_size, level_params):
    pre = jnp.concatenate([_ref_conv_pool(x_pre, w, b) for (w, b) in level_params["pre"]], axis=1)
    pos = jnp.concatenate([_ref_conv_pool(x_pos, w, b) for (w, b) in level_params["pos"]], axis=1)
    return (pre.reshape(batch_size, -1, pre.shape[-1]),
            pos.reshape(batch_size, -1, pos.shape[-1]))


def _ref_forward(x_pre, x_pos, batch_size, params):
    tp, tq = _ref_context_cnn(x_pre, x_pos, batch_size, params["tokens"])
    return _ref_context_cnn(tp, tq, batch_size, params["tokens"])


# --------------------------------- main --------------------------------------
if __name__ == "__main__":
    key = jax.random.PRNGKey(0)
    k_params, k_pre, k_pos = jax.random.split(key, 3)

    batch_size = 2
    num_sents = 4
    num_tokens = 8

    params = init_hierarchical_params(k_params)

    # torch shape (batch*num_sents, 1, num_tokens, feat_dim) -> channel squeezed
    x_pre = jax.random.normal(
        k_pre, (batch_size * num_sents, num_tokens, FEAT_DIM), jnp.float32)
    x_pos = jax.random.normal(
        k_pos, (batch_size * num_sents, num_tokens, FEAT_DIM), jnp.float32)

    fwd = jax.jit(functools.partial(context_hierarchical_cnn_forward,
                                    batch_size=batch_size, params=params))
    sent_pre, sent_pos = fwd(x_pre, x_pos)
    jax.block_until_ready((sent_pre, sent_pos))

    expected = (batch_size, 1, NUM_FILTERS * len(TOKEN_WINDOW_SIZE))
    assert sent_pre.shape == expected, sent_pre.shape
    assert sent_pos.shape == expected, sent_pos.shape
    assert bool(jnp.all(jnp.isfinite(sent_pre))) and bool(jnp.all(jnp.isfinite(sent_pos)))

    ref_pre, ref_pos = _ref_forward(x_pre, x_pos, batch_size, params)
    assert jnp.allclose(sent_pre, ref_pre, atol=1e-4, rtol=1e-4), \
        float(jnp.max(jnp.abs(sent_pre - ref_pre)))
    assert jnp.allclose(sent_pos, ref_pos, atol=1e-4, rtol=1e-4), \
        float(jnp.max(jnp.abs(sent_pos - ref_pos)))

    print("KERNEL_OK")
</pallas_src>

<mosaic_0001>
module attributes {stable_mosaic.version = 11 : i64} {
  func.func @_fused_hier_kernel(%arg0: i32, %arg1: memref<1x40x32xf32, #tpu.memory_space<vmem>>, %arg2: memref<3x32x32xf32, #tpu.memory_space<vmem>>, %arg3: memref<1x32xf32, #tpu.memory_space<vmem>>, %arg4: memref<2x32xi32, #tpu.memory_space<vmem>>, %arg5: memref<1x1x32xf32, #tpu.memory_space<vmem>>) attributes {dimension_semantics = [#tpu.dimension_semantics<parallel>], iteration_bounds = array<i64: 2>, scalar_prefetch = 0 : i64, scratch_operands = 0 : i64, tpu.core_type = #tpu.core_type<tc>, window_params = [{transform_indices = @transform_0, window_bounds = array<i64: 1, 40, 32>}, {pipeline_mode = #tpu.pipeline_mode<synchronous>, transform_indices = @transform_1, window_bounds = array<i64: 3, 32, 32>}, {pipeline_mode = #tpu.pipeline_mode<synchronous>, transform_indices = @transform_2, window_bounds = array<i64: 1, 32>}, {pipeline_mode = #tpu.pipeline_mode<synchronous>, transform_indices = @transform_3, window_bounds = array<i64: 2, 32>}, {transform_indices = @transform_4, window_bounds = array<i64: 1, 1, 32>}]} {
    %c0 = arith.constant 0 : index
    %c0_0 = arith.constant 0 : index
    %0 = vector.load %arg3[%c0, %c0_0] : memref<1x32xf32, #tpu.memory_space<vmem>>, vector<1x32xf32>
    %c0_1 = arith.constant 0 : index
    %c0_2 = arith.constant 0 : index
    %c0_3 = arith.constant 0 : index
    %1 = vector.load %arg1[%c0_1, %c0_2, %c0_3] : memref<1x40x32xf32, #tpu.memory_space<vmem>>, vector<1x40x32xf32>
    %2 = vector.shape_cast %1 : vector<1x40x32xf32> to vector<40x32xf32>
    %3 = vector.extract_strided_slice %2 {offsets = [0, 0], sizes = [32, 32], strides = [1, 1]} : vector<40x32xf32> to vector<32x32xf32>
    %c0_4 = arith.constant 0 : index
    %c0_5 = arith.constant 0 : index
    %c0_6 = arith.constant 0 : index
    %4 = vector.load %arg2[%c0_4, %c0_5, %c0_6] : memref<3x32x32xf32, #tpu.memory_space<vmem>>, vector<1x32x32xf32>
    %5 = vector.shape_cast %4 : vector<1x32x32xf32> to vector<32x32xf32>
    %cst = arith.constant dense<0.000000e+00> : vector<32x32xf32>
    %6 = tpu.matmul %3, %5, %cst {dimension_numbers = #tpu.dot_dimension_numbers<[1], [0], [0], [1], [0, 0, 1, 1], [], []>} : vector<32x32xf32>, vector<32x32xf32>, vector<32x32xf32> -> vector<32x32xf32>
    %7 = vector.extract_strided_slice %2 {offsets = [1, 0], sizes = [32, 32], strides = [1, 1]} : vector<40x32xf32> to vector<32x32xf32>
    %c1 = arith.constant 1 : index
    %c0_7 = arith.constant 0 : index
    %c0_8 = arith.constant 0 : index
    %8 = vector.load %arg2[%c1, %c0_7, %c0_8] : memref<3x32x32xf32, #tpu.memory_space<vmem>>, vector<1x32x32xf32>
    %9 = vector.shape_cast %8 : vector<1x32x32xf32> to vector<32x32xf32>
    %cst_9 = arith.constant dense<0.000000e+00> : vector<32x32xf32>
    %10 = tpu.matmul %7, %9, %cst_9 {dimension_numbers = #tpu.dot_dimension_numbers<[1], [0], [0], [1], [0, 0, 1, 1], [], []>} : vector<32x32xf32>, vector<32x32xf32>, vector<32x32xf32> -> vector<32x32xf32>
    %11 = arith.addf %6, %10 : vector<32x32xf32>
    %12 = vector.extract_strided_slice %2 {offsets = [2, 0], sizes = [32, 32], strides = [1, 1]} : vector<40x32xf32> to vector<32x32xf32>
    %c2 = arith.constant 2 : index
    %c0_10 = arith.constant 0 : index
    %c0_11 = arith.constant 0 : index
    %13 = vector.load %arg2[%c2, %c0_10, %c0_11] : memref<3x32x32xf32, #tpu.memory_space<vmem>>, vector<1x32x32xf32>
    %14 = vector.shape_cast %13 : vector<1x32x32xf32> to vector<32x32xf32>
    %cst_12 = arith.constant dense<0.000000e+00> : vector<32x32xf32>
    %15 = tpu.matmul %12, %14, %cst_12 {dimension_numbers = #tpu.dot_dimension_numbers<[1], [0], [0], [1], [0, 0, 1, 1], [], []>} : vector<32x32xf32>, vector<32x32xf32>, vector<32x32xf32> -> vector<32x32xf32>
    %16 = arith.addf %11, %15 : vector<32x32xf32>
    %17 = vector.broadcast %0 : vector<1x32xf32> to vector<32x32xf32>
    %18 = arith.addf %16, %17 : vector<32x32xf32>
    %cst_13 = arith.constant 0.000000e+00 : f32
    %19 = vector.broadcast %cst_13 : f32 to vector<32x32xf32>
    %20 = arith.maximumf %18, %19 : vector<32x32xf32>
    %21 = vector.shape_cast %20 : vector<32x32xf32> to vector<4x8x32xf32>
    %22 = tpu.iota {dimensions = array<i32: 1>} : vector<4x8x32xi32>
    %c0_14 = arith.constant 0 : index
    %c0_15 = arith.constant 0 : index
    %23 = vector.load %arg4[%c0_14, %c0_15] : memref<2x32xi32, #tpu.memory_space<vmem>>, vector<1x32xi32>
    %24 = vector.shape_cast %23 : vector<1x32xi32> to vector<1x1x32xi32>
    %25 = vector.broadcast %24 : vector<1x1x32xi32> to vector<4x8x32xi32>
    %26 = arith.cmpi sle, %22, %25 : vector<4x8x32xi32>
    %cst_16 = arith.constant 0.000000e+00 : f32
    %27 = vector.broadcast %cst_16 : f32 to vector<4x8x32xf32>
    %28 = arith.select %26, %21, %27 : vector<4x8x32xi1>, vector<4x8x32xf32>
    %cst_17 = arith.constant dense<0xFF800000> : vector<4x32xf32>
    %29 = vector.multi_reduction <maximumf>, %28, %cst_17 [1] : vector<4x8x32xf32> to vector<4x32xf32>
    %cst_18 = arith.constant 0.000000e+00 : f32
    %30 = vector.broadcast %cst_18 : f32 to vector<8x32xf32>
    %31 = tpu.concatenate %29, %30 in 0 : vector<4x32xf32>, vector<8x32xf32> -> vector<12x32xf32>
    %32 = vector.extract_strided_slice %31 {offsets = [0, 0], sizes = [4, 32], strides = [1, 1]} : vector<12x32xf32> to vector<4x32xf32>
    %c0_19 = arith.constant 0 : index
    %c0_20 = arith.constant 0 : index
    %c0_21 = arith.constant 0 : index
    %33 = vector.load %arg2[%c0_19, %c0_20, %c0_21] : memref<3x32x32xf32, #tpu.memory_space<vmem>>, vector<1x32x32xf32>
    %34 = vector.shape_cast %33 : vector<1x32x32xf32> to vector<32x32xf32>
    %cst_22 = arith.constant dense<0.000000e+00> : vector<4x32xf32>
    %35 = tpu.matmul %32, %34, %cst_22 {dimension_numbers = #tpu.dot_dimension_numbers<[1], [0], [0], [1], [0, 0, 1, 1], [], []>} : vector<4x32xf32>, vector<32x32xf32>, vector<4x32xf32> -> vector<4x32xf32>
    %36 = vector.extract_strided_slice %31 {offsets = [1, 0], sizes = [4, 32], strides = [1, 1]} : vector<12x32xf32> to vector<4x32xf32>
    %c1_23 = arith.constant 1 : index
    %c0_24 = arith.constant 0 : index
    %c0_25 = arith.constant 0 : index
    %37 = vector.load %arg2[%c1_23, %c0_24, %c0_25] : memref<3x32x32xf32, #tpu.memory_space<vmem>>, vector<1x32x32xf32>
    %38 = vector.shape_cast %37 : vector<1x32x32xf32> to vector<32x32xf32>
    %cst_26 = arith.constant dense<0.000000e+00> : vector<4x32xf32>
    %39 = tpu.matmul %36, %38, %cst_26 {dimension_numbers = #tpu.dot_dimension_numbers<[1], [0], [0], [1], [0, 0, 1, 1], [], []>} : vector<4x32xf32>, vector<32x32xf32>, vector<4x32xf32> -> vector<4x32xf32>
    %40 = arith.addf %35, %39 : vector<4x32xf32>
    %41 = vector.extract_strided_slice %31 {offsets = [2, 0], sizes = [4, 32], strides = [1, 1]} : vector<12x32xf32> to vector<4x32xf32>
    %c2_27 = arith.constant 2 : index
    %c0_28 = arith.constant 0 : index
    %c0_29 = arith.constant 0 : index
    %42 = vector.load %arg2[%c2_27, %c0_28, %c0_29] : memref<3x32x32xf32, #tpu.memory_space<vmem>>, vector<1x32x32xf32>
    %43 = vector.shape_cast %42 : vector<1x32x32xf32> to vector<32x32xf32>
    %cst_30 = arith.constant dense<0.000000e+00> : vector<4x32xf32>
    %44 = tpu.matmul %41, %43, %cst_30 {dimension_numbers = #tpu.dot_dimension_numbers<[1], [0], [0], [1], [0, 0, 1, 1], [], []>} : vector<4x32xf32>, vector<32x32xf32>, vector<4x32xf32> -> vector<4x32xf32>
    %45 = arith.addf %40, %44 : vector<4x32xf32>
    %46 = vector.broadcast %0 : vector<1x32xf32> to vector<4x32xf32>
    %47 = arith.addf %45, %46 : vector<4x32xf32>
    %cst_31 = arith.constant 0.000000e+00 : f32
    %48 = vector.broadcast %cst_31 : f32 to vector<4x32xf32>
    %49 = arith.maximumf %47, %48 : vector<4x32xf32>
    %50 = tpu.iota {dimensions = array<i32: 0>} : vector<4x32xi32>
    %c1_32 = arith.constant 1 : index
    %c0_33 = arith.constant 0 : index
    %51 = vector.load %arg4[%c1_32, %c0_33] : memref<2x32xi32, #tpu.memory_space<vmem>>, vector<1x32xi32>
    %52 = vector.broadcast %51 : vector<1x32xi32> to vector<4x32xi32>
    %53 = arith.cmpi sle, %50, %52 : vector<4x32xi32>
    %cst_34 = arith.constant 0.000000e+00 : f32
    %54 = vector.broadcast %cst_34 : f32 to vector<4x32xf32>
    %55 = arith.select %53, %49, %54 : vector<4x32xi1>, vector<4x32xf32>
    %cst_35 = arith.constant dense<0xFF800000> : vector<32xf32>
    %56 = vector.multi_reduction <maximumf>, %55, %cst_35 [0] : vector<4x32xf32> to vector<32xf32>
    %57 = vector.shape_cast %56 : vector<32xf32> to vector<1x32xf32>
    %58 = vector.shape_cast %57 : vector<1x32xf32> to vector<1x1x32xf32>
    %c0_36 = arith.constant 0 : index
    %c0_37 = arith.constant 0 : index
    %c0_38 = arith.constant 0 : index
    %59 = vector.load %arg5[%c0_36, %c0_37, %c0_38] : memref<1x1x32xf32, #tpu.memory_space<vmem>>, vector<1x1x32xf32>
    tpu.vector_store %arg5[%c0_36, %c0_37, %c0_38], %58 {strides = array<i32>} : memref<1x1x32xf32, #tpu.memory_space<vmem>>, vector<1x1x32xf32>,
    return
  }
  func.func @transform_0(%arg0: i32) -> (i32, i32, i32) {
    %c0_i32 = arith.constant 0 : i32
    %c0_i32_0 = arith.constant 0 : i32
    %c0_i32_1 = arith.constant 0 : i32
    return %arg0, %c0_i32, %c0_i32_0 : i32, i32, i32
  }
  func.func @transform_1(%arg0: i32) -> (i32, i32, i32) {
    %c0_i32 = arith.constant 0 : i32
    %c0_i32_0 = arith.constant 0 : i32
    %c0_i32_1 = arith.constant 0 : i32
    %c0_i32_2 = arith.constant 0 : i32
    return %c0_i32, %c0_i32_0, %c0_i32_1 : i32, i32, i32
  }
  func.func @transform_2(%arg0: i32) -> (i32, i32) {
    %c0_i32 = arith.constant 0 : i32
    %c0_i32_0 = arith.constant 0 : i32
    %c0_i32_1 = arith.constant 0 : i32
    return %c0_i32, %c0_i32_0 : i32, i32
  }
  func.func @transform_3(%arg0: i32) -> (i32, i32) {
    %c0_i32 = arith.constant 0 : i32
    %c0_i32_0 = arith.constant 0 : i32
    %c0_i32_1 = arith.constant 0 : i32
    return %c0_i32, %c0_i32_0 : i32, i32
  }
  func.func @transform_4(%arg0: i32) -> (i32, i32, i32) {
    %c0_i32 = arith.constant 0 : i32
    %c0_i32_0 = arith.constant 0 : i32
    %c0_i32_1 = arith.constant 0 : i32
    return %arg0, %c0_i32, %c0_i32_0 : i32, i32, i32
  }
}

</mosaic_0001>

<bundles_post_ra>
// kernel: context_hierarchical_cnn_forward.1
= control target key start
LH: loop header
LB: loop body
LE: loop exit
PB: predicated region body
PF: predicated region fallthrough
CT: control target
= control target key end

     0   :  { %s625_s15 = smov 0   ;;  %s760_s0 = inlined_call_operand.vmem [shape: f32[2,40,32], index: 0, kind: input, shape index: {}]   ;;  %s761_s1 = inlined_call_operand.vmem [shape: f32[3,32,32], index: 1, kind: input, shape index: {}]   ;;  %s762_s2 = inlined_call_operand.vmem [shape: f32[1,32], index: 2, kind: input, shape index: {}]   ;;  %s763_s3 = inlined_call_operand.vmem [shape: s32[2,32], index: 3, kind: input, shape index: {}]   ;;  %s764_s4 = inlined_call_operand.vmem [shape: f32[2,1,32], index: 4, kind: output, shape index: {}]  }
   0x1 LB: > { %s549_s16 = sadd.s32 4294967295, %s598_s15   ;;  %p553_p0 = scmp.ge.s32.totalorder %s598_s15, 1  ;;  %s598_s15 = sphi %s625_s15, %s14_s15  }
   0x2   : > { %p162_p1 = scmp.lt.s32.totalorder %s598_s15, 3 }
   0x4   : > { %p163_p2 = pnand %p553_p0, %p162_p1 }
   0x5   : > { %p186_p3 = scmp.lt.s32.totalorder (!%p163_p2), %s549_s16, 1 }
   0x6   : > { %166 = sbr.rel (%p163_p2) target bundleno = 369 (0x171), region = 36 }
   0xb   : > { %v636_v0 = vld [vmem:[%s761_s1 + $0x58] sm:$0xff]  ;;  %v641_v1 = vld [vmem:[%s761_s1 + $0x50] sm:$0xff]  ;;  %v656_v5 = vld [vmem:[%s761_s1 + $0x48] sm:$0xff]  ;;  %s766_s16 = smov (!%p186_p3, %s549_s16), 1  ;;  %vm224_vm0 = vcmask 261120   ;;  %vm304_vm1 = vcmask 1045504   ;;  %v366_v43 = vlaneseq }
   0xc   : > { %v558_v2 = vld [vmem:[%s761_s1 + $0x38] sm:$0xff]  ;;  %334 = vmatpush.msra.mxu2 %v636_v0  ;;  %v557_v4 = vld [vmem:[%s761_s1 + $0x30] sm:$0xff]  ;;  %v556_v7 = vld [vmem:[%s761_s1 + $0x28] sm:$0xff]  ;;  %s580_s11 = smul.u32 40, %s766_s16  ;;  %vm214_vm2 = vcmask 1046528   ;;  %vm407_vm4 = vcmask 1041409   ;;  %s193_s29 = scalar_lea.vmem %s764_s4, %s766_s16 }
   0xd   : > { %245 = vmatpush.msra.mxu0 %v558_v2  ;;  %v203_v3 = vld [vmem:[%s761_s1 + $0x18] sm:$0xff]  ;;  %v202_v6 = vld [vmem:[%s761_s1 + $0x10] sm:$0xff]  ;;  %432 = vmatpush.msra.mxu3 %v558_v2  ;;  %v670_v8 = vld [vmem:[%s761_s1 + $0x40] sm:$0xff]  ;;  %v720_v46 = vshrl.u32 %v366_v43, 7  ;;  %vm409_vm5 = vcmask 1042434   ;;  %vm411_vm6 = vcmask 1043459  }
   0xe   : > { %282 = vmatpush.msra.mxu1 %v203_v3  ;;  %335 = vmatpush.msra.mxu2 %v641_v1  ;;  %v201_v9 = vld [vmem:[%s761_s1 + $0x8] sm:$0xff]  ;;  %v555_v10 = vld [vmem:[%s761_s1 + $0x20] sm:$0xff]  ;;  %s686_s20 = scalar_lea.vmem %s760_s0, %s580_s11  ;;  %vm414_vm7 = vcmask 1043456   ;;  %vm492_vm9 = vcmask 257024   ;;  %vm500_vm10 = vcmask 253952  }
   0xf   : > { %246 = vmatpush.msra.mxu0 %v557_v4  ;;  %433 = vmatpush.msra.mxu3 %v557_v4  ;;  %v200_v11 = vld [vmem:[%s761_s1] sm:$0xff]  ;;  %v196_v13 = vld [vmem:[%s686_s20 + $0x8] sm:$0xff]  ;;  %v197_v18 = vld [vmem:[%s686_s20 + $0x10] sm:$0xff] }
  0x10   : > { %283 = vmatpush.msra.mxu1 %v202_v6  ;;  %336 = vmatpush.msra.mxu2 %v656_v5  ;;  %v195_v12 = vld [vmem:[%s686_s20] sm:$0xff]  ;;  %v306_v15 = vrot.slane %v196_v13, 2  ;;  %v216_v17 = vrot.slane %v196_v13, 1  ;;  %v308_v21 = vrot.slane %v197_v18, 2  ;;  %v218_v22 = vrot.slane %v197_v18, 1  ;;  %v198_v25 = vld [vmem:[%s686_s20 + $0x18] sm:$0xff] }
  0x11   : > { %247 = vmatpush.msra.mxu0 %v556_v7  ;;  %434 = vmatpush.msra.mxu3 %v556_v7  ;;  %v305_v14 = vrot.slane %v195_v12, 2  ;;  %v215_v16 = vrot.slane %v195_v12, 1  ;;  %v310_v26 = vrot.slane %v198_v25, 2  ;;  %v220_v27 = vrot.slane %v198_v25, 1  ;;  %v199_v30 = vld [vmem:[%s686_s20 + $0x20] sm:$0xff] }
  0x12   : > { %284 = vmatpush.msra.mxu1 %v201_v9  ;;  %337 = vmatpush.msra.mxu2 %v670_v8  ;;  %v309_v23 = vsel %vm304_vm1, %v306_v15, %v308_v21  ;;  %v219_v24 = vsel %vm214_vm2, %v216_v17, %v218_v22  ;;  %v312_v31 = vrot.slane %v199_v30, 2  ;;  %v222_v32 = vrot.slane %v199_v30, 1  ;;  %v717_v42 = vld [vmem:[%s762_s2] ss:$0 sm:$0xff] }
  0x13   : > { %248 = vmatpush.msra.mxu0 %v555_v10  ;;  %435 = vmatpush.msra.mxu3 %v555_v10  ;;  %v307_v19 = vsel %vm304_vm1, %v305_v14, %v306_v15  ;;  %v217_v20 = vsel %vm214_vm2, %v215_v16, %v216_v17  ;;  %v311_v28 = vsel %vm304_vm1, %v308_v21, %v310_v26  ;;  %v590_v47 = vld [vmem:[%s763_s3] ss:$0 sm:$0xff] }
  0x14   : > { %285 = vmatpush.msra.mxu1 %v200_v11  ;;  %571 = vmatmul.msk.f32.vlgmr.msra.gmra.mxu2 %vm224_vm0, %v307_v19  ;;  %v221_v29 = vsel %vm214_vm2, %v218_v22, %v220_v27  ;;  %v313_v33 = vsel %vm304_vm1, %v310_v26, %v312_v31  ;;  %v223_v34 = vsel %vm214_vm2, %v220_v27, %v222_v32 }
  0x15   : > { %563 = vmatmul.msk.f32.vlgmr.msra.gmra.mxu1 %vm224_vm0, %v195_v12  ;;  %454 = vmatpush.msrb.mxu3 %v203_v3  ;;  %vm370_vm3 = vcmp.le.s32.totalorder %v720_v46, %v590_v47 }
  0x16   : > { %559 = vmatmul.msk.f32.vlgmr.msra.gmra.mxu0 %vm224_vm0, %v217_v20 }
  0x17   : > { %455 = vmatpush.msrb.mxu3 %v202_v6 }
  0x19   : > { %456 = vmatpush.msrb.mxu3 %v201_v9 }
  0x1b   : > { %457 = vmatpush.msrb.mxu3 %v200_v11 }
  0x1c   : > { %572 = vmatmul.msk.f32.gmra.mxu2 %vm224_vm0, %v309_v23 }
  0x1d   : > { %564 = vmatmul.msk.f32.gmra.mxu1 %vm224_vm0, %v196_v13 }
  0x1e   : > { %560 = vmatmul.msk.f32.gmra.mxu0 %vm224_vm0, %v219_v24 }
  0x24   : > { %573 = vmatmul.msk.f32.gmra.mxu2 %vm224_vm0, %v311_v28 }
  0x25   : > { %565 = vmatmul.msk.f32.gmra.mxu1 %vm224_vm0, %v197_v18 }
  0x26   : > { %561 = vmatmul.msk.f32.gmra.mxu0 %vm224_vm0, %v221_v29 }
  0x2c   : > { %574 = vmatmul.msk.f32.gmra.mxu2 %vm224_vm0, %v313_v33 }
  0x2d   : > { %566 = vmatmul.msk.f32.gmra.mxu1 %vm224_vm0, %v198_v25 }
  0x2e   : > { %562 = vmatmul.msk.f32.gmra.mxu0 %vm224_vm0, %v223_v34 }
  0x92   : > { %v287_v35 = vpop.f32.mrf.mxu1 }
  0x93   : > { %v250_v36 = vpop.f32.mrf.mxu0 }
  0x94   : > { %v288_v37 = vadd.f32 %v287_v35, %v250_v36 }
  0x97   : > { %v339_v38 = vpop.f32.mrf.mxu2 }
  0x98   : > { %v351_v41 = vadd.f32 %v339_v38, %v288_v37 }
  0x9a   : > { %v290_v39 = vpop.f32.mrf.mxu1  ;;  %v358_v45 = vadd.f32 %v717_v42, %v351_v41 }
  0x9b   : > { %v253_v40 = vpop.f32.mrf.mxu0 }
  0x9c   : > { %v291_v44 = vadd.f32 %v290_v39, %v253_v40  ;;  %v362_v52 = vmax.f32 %v358_v45, 0.0 }
  0x9e   : > { %v371_v56 = vsel %vm370_vm3, %v362_v52, 0.0 }
  0x9f   : > { %v342_v48 = vpop.f32.mrf.mxu2  ;;  %v375_v61 = vsel %vm224_vm0, %v371_v56, -inf }
  0xa0   : > { %v352_v50 = vadd.f32 %v342_v48, %v291_v44  ;;  %v376_v4 = vrot.slane %v375_v61, 4 }
  0xa2   : > { %v293_v49 = vpop.f32.mrf.mxu1  ;;  %v359_v53 = vadd.f32 %v717_v42, %v352_v50  ;;  %v377_v13 = vmax.f32 %v375_v61, %v376_v4 }
  0xa3   : > { %v256_v51 = vpop.f32.mrf.mxu0 }
  0xa4   : > { %v363_v54 = vmax.f32 %v359_v53, 0.0  ;;  %v294_v55 = vadd.f32 %v293_v49, %v256_v51  ;;  %v378_v19 = vrot.slane %v377_v13, 2 }
  0xa6   : > { %v372_v57 = vsel %vm370_vm3, %v363_v54, 0.0  ;;  %v379_v26 = vmax.f32 %v377_v13, %v378_v19 }
  0xa7   : > { %v382_v58 = vsel %vm224_vm0, %v372_v57, -inf  ;;  %v345_v59 = vpop.f32.mrf.mxu2 }
  0xa8   : > { %v353_v60 = vadd.f32 %v345_v59, %v294_v55  ;;  %v383_v2 = vrot.slane %v382_v58, 4  ;;  %v380_v31 = vrot.slane %v379_v26, 1 }
  0xaa   : > { %v296_v63 = vpop.f32.mrf.mxu1  ;;  %v360_v3 = vadd.f32 %v717_v42, %v353_v60  ;;  %v384_v9 = vmax.f32 %v382_v58, %v383_v2  ;;  %v381_v36 = vmax.f32 %v379_v26, %v380_v31 }
  0xab   : > { %v259_v62 = vpop.f32.mrf.mxu0 }
  0xac   : > { %v364_v6 = vmax.f32 %v360_v3, 0.0  ;;  %v297_v7 = vadd.f32 %v296_v63, %v259_v62  ;;  %v385_v16 = vrot.slane %v384_v9, 2 }
  0xae   : > { %v373_v10 = vsel %vm370_vm3, %v364_v6, 0.0  ;;  %v386_v22 = vmax.f32 %v384_v9, %v385_v16 }
  0xaf   : > { %v389_v11 = vsel %vm224_vm0, %v373_v10, -inf  ;;  %v348_v12 = vpop.f32.mrf.mxu2 }
  0xb0   : > { %v390_v14 = vrot.slane %v389_v11, 4  ;;  %v354_v15 = vadd.f32 %v348_v12, %v297_v7  ;;  %v387_v28 = vrot.slane %v386_v22, 1 }
  0xb2   : > { %v391_v17 = vmax.f32 %v389_v11, %v390_v14  ;;  %v361_v18 = vadd.f32 %v717_v42, %v354_v15  ;;  %v388_v33 = vmax.f32 %v386_v22, %v387_v28 }
  0xb4   : > { %v392_v20 = vrot.slane %v391_v17, 2  ;;  %v365_v21 = vmax.f32 %v361_v18, 0.0  ;;  %v408_v39 = vsel %vm407_vm4, %v388_v33, %v381_v36 }
  0xb6   : > { %v374_v23 = vsel %vm370_vm3, %v365_v21, 0.0  ;;  %v393_v24 = vmax.f32 %v391_v17, %v392_v20 }
  0xb7   : > { %v396_v25 = vsel %vm224_vm0, %v374_v23, -inf }
  0xb8   : > { %v397_v27 = vrot.slane %v396_v25, 4  ;;  %v394_v30 = vrot.slane %v393_v24, 1 }
  0xba   : > { %v398_v29 = vmax.f32 %v396_v25, %v397_v27  ;;  %v395_v35 = vmax.f32 %v393_v24, %v394_v30 }
  0xbc   : > { %v399_v32 = vrot.slane %v398_v29, 2  ;;  %v410_v40 = vsel %vm409_vm5, %v395_v35, %v408_v39 }
  0xbe   : > { %v400_v34 = vmax.f32 %v398_v29, %v399_v32 }
  0xc0   : > { %v401_v37 = vrot.slane %v400_v34, 1 }
  0xc2   : > { %v402_v38 = vmax.f32 %v400_v34, %v401_v37 }
  0xc4   : > { %v412_v41 = vsel %vm411_vm6, %v402_v38, %v410_v40 }
  0xc5   : > { %v415_v43 = vsel %vm414_vm7, %v412_v41, 0.0 }
  0xc6   : > { %v417_v44 = vrot.slane %v415_v43, 1  ;;  %v462_v45 = vrot.slane %v415_v43, 2 }
  0xc8   : > { %575 = vmatmul.msk.f32.vlgmr.msra.gmra.mxu3 %vm224_vm0, %v417_v44 }
  0xc9   : > { %477 = vmatpush.msra.mxu3 %v636_v0  ;;  %v591_v0 = vld [vmem:[%s763_s3 + $0x1] ss:$0 sm:$0xff] }
  0xca   : > { %vm490_vm8 = vcmp.le.s32.totalorder %v720_v46, %v591_v0 }
  0xcb   : > { %478 = vmatpush.msra.mxu3 %v641_v1 }
  0xcd   : > { %479 = vmatpush.msra.mxu3 %v656_v5 }
  0xcf   : > { %480 = vmatpush.msra.mxu3 %v670_v8 }
  0xd0   : > { %576 = vmatmul.msk.f32.vlgmr.msrb.gmra.mxu3 %vm224_vm0, %v415_v43 }
  0xd8   : > { %577 = vmatmul.msk.f32.vlgmr.msra.gmra.mxu3 %vm224_vm0, %v462_v45 }
 0x14b   : > { %v437_v47 = vpop.f32.mrf.mxu3 }
 0x153   : > { %v459_v48 = vpop.f32.mrf.mxu3 }
 0x154   : > { %v460_v49 = vadd.f32 %v459_v48, %v437_v47 }
 0x15b   : > { %v482_v50 = vpop.f32.mrf.mxu3 }
 0x15c   : > { %v485_v51 = vadd.f32 %v482_v50, %v460_v49 }
 0x15e   : > { %v486_v1 = vadd.f32 %v717_v42, %v485_v51 }
 0x160   : > { %v487_v5 = vmax.f32 %v486_v1, 0.0 }
 0x162   : > { %v491_v8 = vsel %vm490_vm8, %v487_v5, 0.0 }
 0x163   : > { %v493_v52 = vsel %vm492_vm9, %v491_v8, -inf }
 0x164   : > { %v494_v53 = vrot.slane %v493_v52, 4 }
 0x166   : > { %v495_v54 = vmax.f32 %v493_v52, %v494_v53 }
 0x168   : > { %v496_v55 = vrot.slane %v495_v54, 2 }
 0x16a   : > { %v497_v56 = vmax.f32 %v495_v54, %v496_v55 }
 0x16c   : > { %v498_v57 = vrot.slane %v497_v56, 1 }
 0x16e   : > { %v499_v58 = vmax.f32 %v497_v56, %v498_v57 }
 0x170   : > { %501 = vst.msk [vmem:[%s193_s29] sm:$0x1] %vm500_vm10, %v499_v58 }
 0x171 PF: > { %s14_s15 = sadd.s32 1, %s598_s15  }
 0x172   : > { %p11_p4 = scmp.ge.s32.totalorder %s14_s15, 4  }
 0x174   :  { %13 = sbr.rel (!%p11_p4) target bundleno = 1 (0x1), region = 68 }

</bundles_post_ra>
